<compile_context>
chip_gen: v6e
topology: v6e:2x2x1
jax: 0.10.0
libtpu: 0.0.40
codegen_flags: <defaults>
</compile_context>

<pallas_src>
import functools

import jax
import jax.numpy as jnp
from jax.experimental import pallas as pl
from jax.experimental.pallas import tpu as pltpu

LANE = 128        # TPU lane width (last-dim tile)
SUBLANE = 8       # TPU sublane width (second-to-last-dim tile)
NEG_FILL = -9e15  # matches torch fill_value=-9000000000000000.0


def _round_up(x, m):
    return (x + m - 1) // m * m


# ---------------------------------------------------------------------------
# Kernel A: w = tanh(x @ Wx + ref @ Wr + b)   (two accumulating MXU dots,
# equivalent to tanh(cat([x, ref], -1) @ W.T + b) without a wrapper concat)
# ---------------------------------------------------------------------------
def _lin_tanh_kernel(x_ref, r_ref, wx_ref, wr_ref, b_ref, o_ref):
    # x_ref: (TM, Dx)  r_ref: (TM, Dr)  wx_ref: (Dx, O_pad)  wr_ref: (Dr, O_pad)
    # b_ref: (1, O_pad)  o_ref: (TM, O_pad)
    acc = jnp.dot(x_ref[...], wx_ref[...], preferred_element_type=jnp.float32)
    acc = acc + jnp.dot(r_ref[...], wr_ref[...],
                        preferred_element_type=jnp.float32)
    acc = acc + b_ref[...]                          # bias broadcast over rows
    o_ref[...] = jnp.tanh(acc).astype(o_ref.dtype)


def _lin_tanh(x, ref, wx_pad, wr_pad, b_pad, *, tm):
    m_pad, dx = x.shape
    dr = ref.shape[1]
    o_pad = wx_pad.shape[1]
    grid = (m_pad // tm,)
    return pl.pallas_call(
        _lin_tanh_kernel,
        out_shape=jax.ShapeDtypeStruct((m_pad, o_pad), jnp.float32),
        grid=grid,
        in_specs=[
            pl.BlockSpec((tm, dx), lambda i: (i, 0)),      # row tile of x
            pl.BlockSpec((tm, dr), lambda i: (i, 0)),      # row tile of ref
            pl.BlockSpec((dx, o_pad), lambda i: (0, 0)),   # resident weight (x part)
            pl.BlockSpec((dr, o_pad), lambda i: (0, 0)),   # resident weight (ref part)
            pl.BlockSpec((1, o_pad), lambda i: (0, 0)),    # resident bias
        ],
        out_specs=pl.BlockSpec((tm, o_pad), lambda i: (i, 0)),
        compiler_params=pltpu.CompilerParams(
            # Independent row tiles -> shard across TensorCores on v7x.
            dimension_semantics=("parallel",)),
    )(x, ref, wx_pad, wr_pad, b_pad)


# ---------------------------------------------------------------------------
# Kernel B: segment softmax over rows grouped by b_idx (padded rows = -1).
# Per-batch sums and the per-row gather of 1/sum are one-hot MXU matmuls.
# ---------------------------------------------------------------------------
def _segment_softmax_kernel(bidx_col_ref, bidx_row_ref, w_ref, o_ref, *, b_lanes):
    # bidx_col_ref: (N_pad, 1) int32   bidx_row_ref: (1, N_pad) int32
    # w_ref / o_ref: (N_pad, O_pad) f32
    e = jnp.exp(w_ref[...])                          # tanh-bounded -> no max needed
    m_pad = e.shape[0]

    # (B_pad, N_pad) one-hot: row b marks the rows belonging to batch b.
    sel_t = jnp.where(
        bidx_row_ref[...] ==
        jax.lax.broadcasted_iota(jnp.int32, (b_lanes, m_pad), 0),
        1.0, 0.0)
    seg_sum = jnp.dot(sel_t, e, preferred_element_type=jnp.float32)   # (B_pad, O_pad)

    # Guard empty / padded segments (never gathered) against 0-division.
    inv = jnp.where(seg_sum > 0.0, 1.0 / seg_sum, 0.0)

    # (N_pad, B_pad) one-hot: row i marks its own batch; padded rows (-1) match
    # nothing -> their output is 0 and they contribute nothing to any sum.
    sel = jnp.where(
        bidx_col_ref[...] ==
        jax.lax.broadcasted_iota(jnp.int32, (m_pad, b_lanes), 1),
        1.0, 0.0)
    inv_rows = jnp.dot(sel, inv, preferred_element_type=jnp.float32)  # (N_pad, O_pad)

    o_ref[...] = (e * inv_rows).astype(o_ref.dtype)


def _segment_softmax(w, bidx_pad, *, b_lanes):
    m_pad, o_pad = w.shape
    kernel = functools.partial(_segment_softmax_kernel, b_lanes=b_lanes)
    return pl.pallas_call(
        kernel,
        out_shape=jax.ShapeDtypeStruct((m_pad, o_pad), jnp.float32),
        grid=(1,),
        in_specs=[
            pl.BlockSpec((m_pad, 1), lambda i: (0, 0)),
            pl.BlockSpec((1, m_pad), lambda i: (0, 0)),
            pl.BlockSpec((m_pad, o_pad), lambda i: (0, 0)),
        ],
        out_specs=pl.BlockSpec((m_pad, o_pad), lambda i: (0, 0)),
        compiler_params=pltpu.CompilerParams(
            dimension_semantics=("arbitrary",)),
    )(bidx_pad.reshape(m_pad, 1), bidx_pad.reshape(1, m_pad), w)


# ---------------------------------------------------------------------------
# Parameter setup (run ONCE, outside the per-call hot path)
# ---------------------------------------------------------------------------
def prepare_params(weight, bias, dx):
    """Split the PyTorch Linear weight [O, Dx+Dr] into the x / ref halves,
    pre-transpose them and lane-pad O up to a multiple of 128.  Padded output
    columns are zero and sliced off after the final kernel, so semantics are
    unchanged while all kernel stores stay lane-dense."""
    o, din = weight.shape
    o_pad = _round_up(o, LANE)
    wt = weight.T                                    # [Din, O]
    wx_pad = jnp.zeros((dx, o_pad), weight.dtype).at[:, :o].set(wt[:dx])
    wr_pad = jnp.zeros((din - dx, o_pad), weight.dtype).at[:, :o].set(wt[dx:])
    b_pad = jnp.zeros((1, o_pad), bias.dtype).at[0, :o].set(bias)
    return wx_pad, wr_pad, b_pad


# ---------------------------------------------------------------------------
# Forward pass (Pallas equivalent of Attention.forward)
# ---------------------------------------------------------------------------
def attention_forward(x, ref, mask, x_idx, params, out_size, *, tm=1024):
    """x: [N, Dx], ref: [N, Dr], mask: [B, maxN] (only B is needed now),
    x_idx: (b_idx, n_idx) int arrays of length N.  Assumes unique
    (b_idx, n_idx) pairs (same caveat as the PyTorch indexing).
    Returns [N, out_size]."""
    wx_pad, wr_pad, b_pad = params
    n = x.shape[0]
    num_batches = mask.shape[0]
    b_idx, _n_idx = x_idx   # n_idx only located rows inside the (removed) dense tensor

    # Pad rows to a tile multiple so the row-tiled kernel satisfies the
    # sublane rule; cap the tile so small N stays a single step while large N
    # gets many parallel steps.
    tm_eff = min(tm, _round_up(n, SUBLANE))
    m_pad = _round_up(n, tm_eff)
    pad_rows = m_pad - n
    if pad_rows:
        x = jnp.pad(x, ((0, pad_rows), (0, 0)))
        ref = jnp.pad(ref, ((0, pad_rows), (0, 0)))

    # Kernel A: fused linear + tanh on the sparse rows (lane-dense O_pad out).
    w = _lin_tanh(x, ref, wx_pad, wr_pad, b_pad, tm=tm_eff)      # [m_pad, O_pad]

    # Kernel B: segment softmax over the real rows (padded rows tagged -1).
    bidx_pad = jnp.full((m_pad,), -1, dtype=jnp.int32).at[:n].set(
        b_idx.astype(jnp.int32))
    b_lanes = _round_up(max(int(num_batches), 1), LANE)
    out = _segment_softmax(w, bidx_pad, b_lanes=b_lanes)         # [m_pad, O_pad]

    # Drop row padding and the lane padding on the output channels.
    return out[:n, :out_size]


# ---------------------------------------------------------------------------
# Pure-JAX reference (mirrors the PyTorch module exactly, dense formulation)
# ---------------------------------------------------------------------------
def _reference(x, ref, mask, x_idx, weight, bias):
    b_idx, n_idx = x_idx
    xc = jnp.concatenate([x, ref], axis=-1)
    w = jnp.tanh(jnp.dot(xc, weight.T, precision=jax.lax.Precision.HIGHEST) + bias)
    b, max_n = mask.shape
    o = weight.shape[0]
    dense = jnp.full((b, max_n, o), NEG_FILL, dtype=w.dtype)
    dense = dense.at[b_idx, n_idx].set(w)
    dense = jax.nn.softmax(dense, axis=-2)
    return dense[b_idx, n_idx]


if __name__ == "__main__":
    key = jax.random.PRNGKey(0)
    k_x, k_r, k_w, k_b = jax.random.split(key, 4)

    # Small shapes consistent with the module: 2 graphs padded to 16 nodes,
    # 12 and 9 real nodes, Dx = Dr = 16 -> in_size = 32, out_size = 32.
    batch, max_n = 2, 16
    n_per = (12, 9)
    dx = dr = 16
    in_size, out_size = dx + dr, 32

    b_idx = jnp.concatenate(
        [jnp.full((k,), i, dtype=jnp.int32) for i, k in enumerate(n_per)])
    n_idx = jnp.concatenate(
        [jnp.arange(k, dtype=jnp.int32) for k in n_per])
    n = int(b_idx.shape[0])
    mask = jnp.zeros((batch, max_n), dtype=jnp.bool_).at[b_idx, n_idx].set(True)
    x_idx = (b_idx, n_idx)

    x = jax.random.normal(k_x, (n, dx), dtype=jnp.float32)
    ref = jax.random.normal(k_r, (n, dr), dtype=jnp.float32)

    # Deterministic init mimicking nn.Linear: U(-1/sqrt(in), 1/sqrt(in)).
    bound = 1.0 / (in_size ** 0.5)
    weight = jax.random.uniform(k_w, (out_size, in_size),
                                minval=-bound, maxval=bound, dtype=jnp.float32)
    bias = jax.random.uniform(k_b, (out_size,),
                              minval=-bound, maxval=bound, dtype=jnp.float32)

    # One-time parameter prep (outside the per-call hot path).
    params = prepare_params(weight, bias, dx)

    out = attention_forward(x, ref, mask, x_idx, params, out_size)
    jax.block_until_ready(out)

    expected = _reference(x, ref, mask, x_idx, weight, bias)
    assert out.shape == (n, out_size)
    assert jnp.allclose(out, expected, atol=1e-5, rtol=1e-4)

    print("KERNEL_OK")
</pallas_src>

<mosaic_0001>
module attributes {stable_mosaic.version = 11 : i64} {
  func.func @_lin_tanh_kernel(%arg0: i32, %arg1: memref<24x16xf32, #tpu.memory_space<vmem>>, %arg2: memref<24x16xf32, #tpu.memory_space<vmem>>, %arg3: memref<16x128xf32, #tpu.memory_space<vmem>>, %arg4: memref<16x128xf32, #tpu.memory_space<vmem>>, %arg5: memref<1x128xf32, #tpu.memory_space<vmem>>, %arg6: memref<24x128xf32, #tpu.memory_space<vmem>>) attributes {dimension_semantics = [#tpu.dimension_semantics<parallel>], iteration_bounds = array<i64: 1>, scalar_prefetch = 0 : i64, scratch_operands = 0 : i64, tpu.core_type = #tpu.core_type<tc>, window_params = [{transform_indices = @transform_0, window_bounds = array<i64: 24, 16>}, {transform_indices = @transform_1, window_bounds = array<i64: 24, 16>}, {pipeline_mode = #tpu.pipeline_mode<synchronous>, transform_indices = @transform_2, window_bounds = array<i64: 16, 128>}, {pipeline_mode = #tpu.pipeline_mode<synchronous>, transform_indices = @transform_3, window_bounds = array<i64: 16, 128>}, {pipeline_mode = #tpu.pipeline_mode<synchronous>, transform_indices = @transform_4, window_bounds = array<i64: 1, 128>}, {transform_indices = @transform_5, window_bounds = array<i64: 24, 128>}]} {
    %c0 = arith.constant 0 : index
    %c0_0 = arith.constant 0 : index
    %0 = vector.load %arg1[%c0, %c0_0] : memref<24x16xf32, #tpu.memory_space<vmem>>, vector<24x16xf32>
    %c0_1 = arith.constant 0 : index
    %c0_2 = arith.constant 0 : index
    %1 = vector.load %arg3[%c0_1, %c0_2] : memref<16x128xf32, #tpu.memory_space<vmem>>, vector<16x128xf32>
    %cst = arith.constant dense<0.000000e+00> : vector<24x128xf32>
    %2 = tpu.matmul %0, %1, %cst {dimension_numbers = #tpu.dot_dimension_numbers<[1], [0], [0], [1], [0, 0, 1, 1], [], []>} : vector<24x16xf32>, vector<16x128xf32>, vector<24x128xf32> -> vector<24x128xf32>
    %c0_3 = arith.constant 0 : index
    %c0_4 = arith.constant 0 : index
    %3 = vector.load %arg2[%c0_3, %c0_4] : memref<24x16xf32, #tpu.memory_space<vmem>>, vector<24x16xf32>
    %c0_5 = arith.constant 0 : index
    %c0_6 = arith.constant 0 : index
    %4 = vector.load %arg4[%c0_5, %c0_6] : memref<16x128xf32, #tpu.memory_space<vmem>>, vector<16x128xf32>
    %cst_7 = arith.constant dense<0.000000e+00> : vector<24x128xf32>
    %5 = tpu.matmul %3, %4, %cst_7 {dimension_numbers = #tpu.dot_dimension_numbers<[1], [0], [0], [1], [0, 0, 1, 1], [], []>} : vector<24x16xf32>, vector<16x128xf32>, vector<24x128xf32> -> vector<24x128xf32>
    %6 = arith.addf %2, %5 : vector<24x128xf32>
    %c0_8 = arith.constant 0 : index
    %c0_9 = arith.constant 0 : index
    %7 = vector.load %arg5[%c0_8, %c0_9] : memref<1x128xf32, #tpu.memory_space<vmem>>, vector<1x128xf32>
    %8 = vector.broadcast %7 : vector<1x128xf32> to vector<24x128xf32>
    %9 = arith.addf %6, %8 : vector<24x128xf32>
    %10 = math.tanh %9 : vector<24x128xf32>
    %c0_10 = arith.constant 0 : index
    %c0_11 = arith.constant 0 : index
    %11 = vector.load %arg6[%c0_10, %c0_11] : memref<24x128xf32, #tpu.memory_space<vmem>>, vector<24x128xf32>
    tpu.vector_store %arg6[%c0_10, %c0_11], %10 {strides = array<i32>} : memref<24x128xf32, #tpu.memory_space<vmem>>, vector<24x128xf32>,
    return
  }
  func.func @transform_0(%arg0: i32) -> (i32, i32) {
    %c0_i32 = arith.constant 0 : i32
    %c0_i32_0 = arith.constant 0 : i32
    return %arg0, %c0_i32 : i32, i32
  }
  func.func @transform_1(%arg0: i32) -> (i32, i32) {
    %c0_i32 = arith.constant 0 : i32
    %c0_i32_0 = arith.constant 0 : i32
    return %arg0, %c0_i32 : i32, i32
  }
  func.func @transform_2(%arg0: i32) -> (i32, i32) {
    %c0_i32 = arith.constant 0 : i32
    %c0_i32_0 = arith.constant 0 : i32
    %c0_i32_1 = arith.constant 0 : i32
    return %c0_i32, %c0_i32_0 : i32, i32
  }
  func.func @transform_3(%arg0: i32) -> (i32, i32) {
    %c0_i32 = arith.constant 0 : i32
    %c0_i32_0 = arith.constant 0 : i32
    %c0_i32_1 = arith.constant 0 : i32
    return %c0_i32, %c0_i32_0 : i32, i32
  }
  func.func @transform_4(%arg0: i32) -> (i32, i32) {
    %c0_i32 = arith.constant 0 : i32
    %c0_i32_0 = arith.constant 0 : i32
    %c0_i32_1 = arith.constant 0 : i32
    return %c0_i32, %c0_i32_0 : i32, i32
  }
  func.func @transform_5(%arg0: i32) -> (i32, i32) {
    %c0_i32 = arith.constant 0 : i32
    %c0_i32_0 = arith.constant 0 : i32
    return %arg0, %c0_i32 : i32, i32
  }
}

</mosaic_0001>

<bundles_post_ra>
// kernel: tpu_custom_call.1
= control target key start
LH: loop header
LB: loop body
LE: loop exit
PB: predicated region body
PF: predicated region fallthrough
CT: control target
= control target key end

     0   :  { %v318_v2 = vmov 0.0   ;;  %vm31_vm0 = vcmask 130048   ;;  %s395_s0 = inlined_call_operand.vmem [shape: f32[24,16], index: 0, kind: input, shape index: {}]   ;;  %s396_s1 = inlined_call_operand.vmem [shape: f32[24,16], index: 1, kind: input, shape index: {}]   ;;  %s397_s2 = inlined_call_operand.vmem [shape: f32[16,128], index: 2, kind: input, shape index: {}]   ;;  %s398_s3 = inlined_call_operand.vmem [shape: f32[16,128], index: 3, kind: input, shape index: {}]   ;;  %s399_s4 = inlined_call_operand.vmem [shape: f32[1,128], index: 4, kind: input, shape index: {}]   ;;  %s400_s5 = inlined_call_operand.hbm [shape: f32[24,128], index: 5, kind: output, shape index: {}]  }
   0x1   :  { %v30_v0 = vld [vmem:[%s398_s3 + $0x8] sm:$0xff]  ;;  %259 = vmatprep.subr.mxu0 %v318_v2  ;;  %272 = vmatprep.subr.mxu1 %v318_v2  ;;  %v29_v3 = vld [vmem:[%s398_s3] sm:$0xff] }
   0x2   :  { %v25_v1 = vld [vmem:[%s397_s2 + $0x8] sm:$0xff]  ;;  %260 = vmatpush3.msra.mxu0 %v30_v0  ;;  %v24_v4 = vld [vmem:[%s397_s2] sm:$0xff] }
   0x3   :  { %273 = vmatpush3.msra.mxu1 %v25_v1  ;;  %261 = vmatprep.subr.mxu0 %v318_v2  ;;  %v26_v5 = vld [vmem:[%s396_s1] sm:$0xff] }
   0x4   :  { %274 = vmatprep.subr.mxu1 %v318_v2  ;;  %v21_v6 = vld [vmem:[%s395_s0] sm:$0xff] }
   0x5   :  { %10 = vsyncpa [#allocation3], 0  ;;  %262 = vmatpush3.msra.mxu0 %v29_v3  ;;  %vm319_vm1 = vmmov 0   ;;  %275 = vmatpush3.msra.mxu1 %v24_v4  ;;  %v27_v7 = vld [vmem:[%s396_s1 + $0x8] sm:$0xff]  ;;  %v28_v9 = vld [vmem:[%s396_s1 + $0x10] sm:$0xff] }
   0x6   :  { %263 = vmatprep.mubr.msk.f32.mxu0 %vm319_vm1, %v318_v2  ;;  %276 = vmatprep.mubr.msk.f32.mxu1 %vm319_vm1, %v318_v2  ;;  %v22_v8 = vld [vmem:[%s395_s0 + $0x8] sm:$0xff]  ;;  %v23_v10 = vld [vmem:[%s395_s0 + $0x10] sm:$0xff]  ;;  %v248_v13 = vld [vmem:[%s399_s4] ss:$0 sm:$0xff]  ;;  %s320_s0 = smov [#allocation2]  }
   0x7   :  { %264 = vmatmul.mubr.msk.f32.vlgmr.msra.gmra.mxu0 %vm31_vm0, %v26_v5  ;;  %277 = vmatmul.mubr.msk.f32.vlgmr.msra.gmra.mxu1 %vm31_vm0, %v21_v6  ;;  %s231_s1 = sshll.u32 %s320_s0, 4  ;;  %s232_s1 = int_to_ptr.vmem [resolvable:$true] %s231_s1 }
   0x8   :  { %266 = vmatprep.mubr.msk.f32.mxu0 %vm319_vm1, %v318_v2  ;;  %279 = vmatprep.mubr.msk.f32.mxu1 %vm319_vm1, %v318_v2  ;;  %s296_s4 = scalar_lea.vmem %s232_s1, 384  ;;  %p301_p1 = scmp.lt.s32.totalorder %s232_s1, %s232_s1 }
   0x9   :  { %p297_p0 = scmp.ne.s32.totalorder %s232_s1, %s296_s4  ;;  %p302_p2 = scmp.lt.s32.totalorder %s296_s4, %s296_s4 }
   0xb   :  { %267 = vmatmul.mubr.msk.f32.gmra.mxu0 %vm31_vm0, %v27_v7  ;;  %280 = vmatmul.mubr.msk.f32.gmra.mxu1 %vm31_vm0, %v22_v8  ;;  %p303_p3 = por %p302_p2, %p301_p1 }
   0xc   :  { %269 = vmatprep.mubr.msk.f32.mxu0 %vm319_vm1, %v318_v2  ;;  %282 = vmatprep.mubr.msk.f32.mxu1 %vm319_vm1, %v318_v2 }
   0xd   :  { %p304_p4 = pnand %p303_p3, %p297_p0 }
   0xf   :  { %270 = vmatmul.mubr.msk.f32.gmra.mxu0 %vm31_vm0, %v28_v9  ;;  %283 = vmatmul.mubr.msk.f32.gmra.mxu1 %vm31_vm0, %v23_v10 }
  0xc7   :  { %v107_v11 = vpop.f32.mrf.mxu0  ;;  %v196_v12 = vpop.f32.mrf.mxu1 }
  0xc8   :  { %v197_v14 = vadd.f32 %v196_v12, %v107_v11 }
  0xc9   :  { %v265_v15 = vpop.f32.mrf.mxu0  ;;  %v278_v16 = vpop.f32.mrf.mxu1 }
  0xca   :  { %v217_v17 = vadd.f32 %v248_v13, %v197_v14 }
  0xcb   :  { %v112_v18 = vpop.f32.mrf.mxu0  ;;  %v201_v19 = vpop.f32.mrf.mxu1 }
  0xcc   :  { %290 = vtanh.f32 %v217_v17  ;;  %v202_v20 = vadd.f32 %v201_v19, %v112_v18 }
  0xcd   :  { %v268_v21 = vpop.f32.mrf.mxu0  ;;  %v281_v22 = vpop.f32.mrf.mxu1 }
  0xce   :  { %v218_v23 = vadd.f32 %v248_v13, %v202_v20 }
  0xcf   :  { %v117_v24 = vpop.f32.mrf.mxu0  ;;  %v206_v25 = vpop.f32.mrf.mxu1 }
  0xd0   :  { %292 = vtanh.f32 %v218_v23  ;;  %v207_v26 = vadd.f32 %v206_v25, %v117_v24 }
  0xd1   :  { %v271_v27 = vpop.f32.mrf.mxu0  ;;  %v284_v28 = vpop.f32.mrf.mxu1 }
  0xd2   :  { %v219_v29 = vadd.f32 %v248_v13, %v207_v26 }
  0xd4   :  { %294 = vtanh.f32 %v219_v29 }
  0xd9   :  { %v291_v30 = vpop.eup %290 }
  0xda   :  { %223 = vst [vmem:[#allocation2] sm:$0xff] %v291_v30 }
  0xdd   :  { %v293_v31 = vpop.eup %292 }
  0xde   :  { %224 = vst [vmem:[#allocation2 + $0x8] sm:$0xff] %v293_v31 }
  0xe1   :  { %v295_v32 = vpop.eup %294 }
  0xe2   :  { %225 = vst [vmem:[#allocation2 + $0x10] sm:$0xff] %v295_v32 }
  0xe3   :  { %307 = shalt.err (!%p304_p4)
}
  0xe4   :  { %s321_s13 = smov 128   ;;  %s322_s14 = smov 8  }
  0xe5   :  { %237 = dma.vmem_to_hbm [thread:$0]  %s232_s1, 384, %s400_s5, [#allocation3], %s321_s13, %s321_s13, %s322_s14  }
  0xe6   :  { %316 = dma.done.wait [#allocation3], 384  }
  0xe7   :  { %317 = vsyncadd [#allocation3], 4294966912 }
  0xe8   :  { %241 = vsyncpa [#allocation3], 1 }

</bundles_post_ra>
